<compile_context>
chip_gen: v5e
topology: v5e:2x2
jax: 0.10.0
libtpu: 0.0.40
codegen_flags: <defaults>
</compile_context>

<pallas_src>
import functools

import jax
import jax.numpy as jnp
from jax.experimental import pallas as pl
from jax.experimental.pallas import tpu as pltpu


def _round_up(v, m):
    return (v + m - 1) // m * m


def _pick_divisor(dim, requested, granule):
    """Largest multiple of `granule` <= min(requested, dim) that divides `dim`."""
    t = (min(requested, dim) // granule) * granule
    while t >= granule:
        if dim % t == 0:
            return t
        t -= granule
    return None


def _residual_linear_kernel(x_ref, w_ref, b_ref, o_ref, acc_ref, *, mxu_dtype):
    # x_ref  : (tm, tk) f32   rows i, K-columns k of x (single x stream)
    # w_ref  : (tk, tn)       weight tile, already (K, N) layout, MXU dtype
    # b_ref  : (1,  tn) f32   bias tile
    # o_ref  : (tm, tn)       output tile (resident across the k axis)
    # acc_ref: (tm, tn) f32   accumulator scratch
    j = pl.program_id(1)
    k = pl.program_id(2)

    x_tile = x_ref[...]

    # Initialize the accumulator with the broadcast bias: hoists the bias add
    # off the epilogue / critical path into the cheap first-k step.
    @pl.when(k == 0)
    def _():
        acc_ref[...] = jnp.broadcast_to(
            b_ref[...].astype(jnp.float32), acc_ref.shape)

    # Residual add: tn == tk and N == K, so the x tile at k == j covers exactly
    # this output tile's columns.  Added in f32 (full precision), reusing the
    # same HBM stream as the matmul operand.
    @pl.when(k == j)
    def _():
        acc_ref[...] += x_tile.astype(jnp.float32)

    # MXU matmul with low-precision operands, f32 accumulation.
    acc_ref[...] += jnp.dot(
        x_tile.astype(mxu_dtype), w_ref[...],
        preferred_element_type=jnp.float32)

    @pl.when(k == pl.num_programs(2) - 1)
    def _():
        o_ref[...] = acc_ref[...].astype(o_ref.dtype)


def residual_forward(x, w, b, *, tm=512, t_feat=512, mxu_dtype=jnp.bfloat16):
    """Residual(Linear) forward:  y = x + (x @ w.T + b)

    x: (M, H) f32
    w: (H, H) in PyTorch (out_features, in_features) layout
    b: (H,)
    mxu_dtype: dtype of the MXU operands (accumulation, bias and residual stay
               f32).  Pass jnp.float32 / None for an exact f32 matmul.
    """
    M, K = x.shape
    N = w.shape[0]
    assert w.shape == (N, K) and b.shape == (N,)
    assert N == K, "residual requires matching input/output feature dims"
    H = N
    if mxu_dtype is None:
        mxu_dtype = x.dtype

    # ---- feature (N == K) tiling: pad H to a lane multiple, pick a divisor --
    Hp = _round_up(H, 128)
    t = _pick_divisor(Hp, t_feat, 128)          # always succeeds (128 | Hp)

    # ---- row (M) tiling: prefer no padding ----------------------------------
    if M <= tm:
        tm_eff = M                              # single full-extent row tile
        Mp = M
    else:
        tm_eff = _pick_divisor(M, tm, 8)
        if tm_eff is not None:
            Mp = M
        else:                                   # ragged M: pad rows (rare)
            tm_eff = tm
            Mp = _round_up(M, tm_eff)

    # ---- keep >= 2 parallel tiles so both v7x TensorCores get work ----------
    if (Mp // tm_eff) * (Hp // t) < 2 and Hp >= 256:
        t_small = _pick_divisor(Hp, max(t // 2, 128), 128)
        if t_small is not None and Hp // t_small >= 2:
            t = t_small

    # ---- operand prep (weight prep is one-time in real use) -----------------
    w_prep, b_prep, x_prep = w, b, x
    if Hp != H:
        w_prep = jnp.pad(w, ((0, Hp - H), (0, Hp - H)))
        b_prep = jnp.pad(b, (0, Hp - H))
        x_prep = jnp.pad(x, ((0, 0), (0, Hp - H)))
    if Mp != M:
        x_prep = jnp.pad(x_prep, ((0, Mp - M), (0, 0)))
    w_kn = w_prep.T.astype(mxu_dtype)           # (K, N) MXU-ready layout
    b2 = b_prep.reshape(1, Hp).astype(jnp.float32)

    grid = (Mp // tm_eff, Hp // t, Hp // t)

    kernel = functools.partial(_residual_linear_kernel, mxu_dtype=mxu_dtype)

    weight_rereads = Mp // tm_eff
    bytes_accessed = (x_prep.size * x_prep.dtype.itemsize
                      + weight_rereads * w_kn.size * w_kn.dtype.itemsize
                      + b2.size * 4
                      + Mp * Hp * x.dtype.itemsize)

    out = pl.pallas_call(
        kernel,
        out_shape=jax.ShapeDtypeStruct((Mp, Hp), x.dtype),
        grid_spec=pltpu.PrefetchScalarGridSpec(
            num_scalar_prefetch=0,
            grid=grid,
            in_specs=[
                pl.BlockSpec((tm_eff, t), lambda i, j, k: (i, k)),  # x (f32)
                pl.BlockSpec((t, t), lambda i, j, k: (k, j)),       # W (K, N)
                pl.BlockSpec((1, t), lambda i, j, k: (0, j)),       # bias
            ],
            out_specs=pl.BlockSpec((tm_eff, t), lambda i, j, k: (i, j)),
            scratch_shapes=[pltpu.VMEM((tm_eff, t), jnp.float32)],
        ),
        compiler_params=pltpu.CompilerParams(
            dimension_semantics=("parallel", "parallel", "arbitrary")),
        cost_estimate=pl.CostEstimate(
            flops=2 * Mp * Hp * Hp + 2 * Mp * Hp,
            transcendentals=0,
            bytes_accessed=bytes_accessed),
    )(x_prep, w_kn, b2)

    if Mp != M or Hp != H:
        out = out[:M, :H]
    return out


if __name__ == "__main__":
    key = jax.random.PRNGKey(0)

    # --- case 1: small shapes, divisible H; exercises M < tm, multi-j/k grid.
    M, H = 50, 256
    kx, kw, kb = jax.random.split(key, 3)
    x = jax.random.normal(kx, (M, H), dtype=jnp.float32)
    w = jax.random.normal(kw, (H, H), dtype=jnp.float32) * 0.02   # (out, in)
    b = jax.random.normal(kb, (H,), dtype=jnp.float32) * 0.02
    ref = x + (x @ w.T + b)

    # Default bf16 MXU operands (f32 accumulation / bias / residual).
    out_bf16 = jax.block_until_ready(residual_forward(x, w, b))
    assert out_bf16.shape == (M, H)
    assert jnp.allclose(out_bf16, ref, atol=2e-2, rtol=2e-2)

    # Exact f32 matmul path.
    out_f32 = jax.block_until_ready(
        residual_forward(x, w, b, mxu_dtype=jnp.float32))
    assert jnp.allclose(out_f32, ref, atol=1e-4, rtol=1e-4)

    # --- case 2: non-lane-aligned H (exercises the H-padding path).
    M2, H2 = 50, 200
    kx2, kw2, kb2 = jax.random.split(jax.random.PRNGKey(1), 3)
    x2 = jax.random.normal(kx2, (M2, H2), dtype=jnp.float32)
    w2 = jax.random.normal(kw2, (H2, H2), dtype=jnp.float32) * 0.02
    b2 = jax.random.normal(kb2, (H2,), dtype=jnp.float32) * 0.02
    ref2 = x2 + (x2 @ w2.T + b2)
    out2 = jax.block_until_ready(residual_forward(x2, w2, b2))
    assert out2.shape == (M2, H2)
    assert jnp.allclose(out2, ref2, atol=2e-2, rtol=2e-2)

    print("KERNEL_OK")
</pallas_src>

<mosaic_0001>
module attributes {stable_mosaic.version = 11 : i64} {
  func.func @_residual_linear_kernel(%arg0: i32, %arg1: i32, %arg2: i32, %arg3: memref<50x128xf32, #tpu.memory_space<vmem>>, %arg4: memref<128x128xbf16, #tpu.memory_space<vmem>>, %arg5: memref<1x128xf32, #tpu.memory_space<vmem>>, %arg6: memref<50x128xf32, #tpu.memory_space<vmem>>, %arg7: memref<50x128xf32, #tpu.memory_space<vmem>>) attributes {dimension_semantics = [#tpu.dimension_semantics<parallel>, #tpu.dimension_semantics<parallel>, #tpu.dimension_semantics<arbitrary>], iteration_bounds = array<i64: 1, 2, 2>, scalar_prefetch = 0 : i64, scratch_operands = 1 : i64, tpu.core_type = #tpu.core_type<tc>, window_params = [{transform_indices = @transform_0, window_bounds = array<i64: 50, 128>}, {transform_indices = @transform_1, window_bounds = array<i64: 128, 128>}, {transform_indices = @transform_2, window_bounds = array<i64: 1, 128>}, {transform_indices = @transform_3, window_bounds = array<i64: 50, 128>}]} {
    %c0 = arith.constant 0 : index
    %c0_0 = arith.constant 0 : index
    %0 = vector.load %arg3[%c0, %c0_0] : memref<50x128xf32, #tpu.memory_space<vmem>>, vector<50x128xf32>
    %c0_i32 = arith.constant 0 : i32
    %1 = arith.cmpi eq, %arg2, %c0_i32 : i32
    %2 = arith.extui %1 : i1 to i32
    %c0_i32_1 = arith.constant 0 : i32
    %3 = arith.cmpi ne, %2, %c0_i32_1 : i32
    scf.if %3 {
      %c0_10 = arith.constant 0 : index
      %c0_11 = arith.constant 0 : index
      %16 = vector.load %arg5[%c0_10, %c0_11] : memref<1x128xf32, #tpu.memory_space<vmem>>, vector<1x128xf32>
      %17 = vector.shape_cast %16 : vector<1x128xf32> to vector<1x128xf32>
      %18 = vector.broadcast %17 : vector<1x128xf32> to vector<50x128xf32>
      %c0_12 = arith.constant 0 : index
      %c0_13 = arith.constant 0 : index
      %19 = vector.load %arg7[%c0_12, %c0_13] : memref<50x128xf32, #tpu.memory_space<vmem>>, vector<50x128xf32>
      tpu.vector_store %arg7[%c0_12, %c0_13], %18 {strides = array<i32>} : memref<50x128xf32, #tpu.memory_space<vmem>>, vector<50x128xf32>,
    } else {
    }
    %4 = arith.cmpi eq, %arg2, %arg1 : i32
    %5 = arith.extui %4 : i1 to i32
    %c0_i32_2 = arith.constant 0 : i32
    %6 = arith.cmpi ne, %5, %c0_i32_2 : i32
    scf.if %6 {
      %c0_10 = arith.constant 0 : index
      %c0_11 = arith.constant 0 : index
      %16 = vector.load %arg7[%c0_10, %c0_11] : memref<50x128xf32, #tpu.memory_space<vmem>>, vector<50x128xf32>
      %17 = arith.addf %16, %0 : vector<50x128xf32>
      %c0_12 = arith.constant 0 : index
      %c0_13 = arith.constant 0 : index
      %18 = vector.load %arg7[%c0_12, %c0_13] : memref<50x128xf32, #tpu.memory_space<vmem>>, vector<50x128xf32>
      tpu.vector_store %arg7[%c0_12, %c0_13], %17 {strides = array<i32>} : memref<50x128xf32, #tpu.memory_space<vmem>>, vector<50x128xf32>,
    } else {
    }
    %c0_3 = arith.constant 0 : index
    %c0_4 = arith.constant 0 : index
    %7 = vector.load %arg7[%c0_3, %c0_4] : memref<50x128xf32, #tpu.memory_space<vmem>>, vector<50x128xf32>
    %8 = arith.truncf %0 : vector<50x128xf32> to vector<50x128xbf16>
    %c0_5 = arith.constant 0 : index
    %c0_6 = arith.constant 0 : index
    %9 = vector.load %arg4[%c0_5, %c0_6] : memref<128x128xbf16, #tpu.memory_space<vmem>>, vector<128x128xbf16>
    %cst = arith.constant dense<0.000000e+00> : vector<50x128xf32>
    %10 = tpu.matmul %8, %9, %cst {dimension_numbers = #tpu.dot_dimension_numbers<[1], [0], [0], [1], [0, 0, 1, 1], [], []>} : vector<50x128xbf16>, vector<128x128xbf16>, vector<50x128xf32> -> vector<50x128xf32>
    %11 = arith.addf %7, %10 : vector<50x128xf32>
    %c0_7 = arith.constant 0 : index
    %c0_8 = arith.constant 0 : index
    %12 = vector.load %arg7[%c0_7, %c0_8] : memref<50x128xf32, #tpu.memory_space<vmem>>, vector<50x128xf32>
    tpu.vector_store %arg7[%c0_7, %c0_8], %11 {strides = array<i32>} : memref<50x128xf32, #tpu.memory_space<vmem>>, vector<50x128xf32>,
    %c1_i32 = arith.constant 1 : i32
    %13 = arith.cmpi eq, %arg2, %c1_i32 : i32
    %14 = arith.extui %13 : i1 to i32
    %c0_i32_9 = arith.constant 0 : i32
    %15 = arith.cmpi ne, %14, %c0_i32_9 : i32
    scf.if %15 {
      %c0_10 = arith.constant 0 : index
      %c0_11 = arith.constant 0 : index
      %16 = vector.load %arg7[%c0_10, %c0_11] : memref<50x128xf32, #tpu.memory_space<vmem>>, vector<50x128xf32>
      %c0_12 = arith.constant 0 : index
      %c0_13 = arith.constant 0 : index
      %17 = vector.load %arg6[%c0_12, %c0_13] : memref<50x128xf32, #tpu.memory_space<vmem>>, vector<50x128xf32>
      tpu.vector_store %arg6[%c0_12, %c0_13], %16 {strides = array<i32>} : memref<50x128xf32, #tpu.memory_space<vmem>>, vector<50x128xf32>,
    } else {
    }
    return
  }
  func.func @transform_0(%arg0: i32, %arg1: i32, %arg2: i32) -> (i32, i32) {
    %c0_i32 = arith.constant 0 : i32
    return %arg0, %arg2 : i32, i32
  }
  func.func @transform_1(%arg0: i32, %arg1: i32, %arg2: i32) -> (i32, i32) {
    %c0_i32 = arith.constant 0 : i32
    return %arg2, %arg1 : i32, i32
  }
  func.func @transform_2(%arg0: i32, %arg1: i32, %arg2: i32) -> (i32, i32) {
    %c0_i32 = arith.constant 0 : i32
    %c0_i32_0 = arith.constant 0 : i32
    return %c0_i32, %arg1 : i32, i32
  }
  func.func @transform_3(%arg0: i32, %arg1: i32, %arg2: i32) -> (i32, i32) {
    %c0_i32 = arith.constant 0 : i32
    return %arg0, %arg1 : i32, i32
  }
}

</mosaic_0001>

<bundles_post_ra>
// kernel: tpu_custom_call.1
= control target key start
LH: loop header
LB: loop body
LE: loop exit
PB: predicated region body
PF: predicated region fallthrough
CT: control target
= control target key end

     0   :  { %s1491_s0 = inlined_call_operand.hbm [shape: f32[50,256], index: 0, kind: input, shape index: {}]   ;;  %s1492_s1 = inlined_call_operand.hbm [shape: bf16[256,256], index: 1, kind: input, shape index: {}]   ;;  %s1493_s2 = inlined_call_operand.hbm [shape: f32[1,256], index: 2, kind: input, shape index: {}]   ;;  %s1494_s3 = inlined_call_operand.hbm [shape: f32[50,256], index: 3, kind: output, shape index: {}]  }
   0x1   :  { %1503 = sst [smem:[#allocation20_spill]] %s1491_s0 }
   0x2   :  { %1504 = sst [smem:[#allocation21_spill]] %s1492_s1 }
   0x3   :  { %1505 = sst [smem:[#allocation22_spill]] %s1494_s3 }
   0x4   :  { %8 = vsyncpa [#allocation4], 0 }
   0x5   :  { %10 = vsyncpa [#allocation4 + $0x1], 0 }
   0x6   :  { %11 = vsyncpa [#allocation7], 0 }
   0x7   :  { %13 = vsyncpa [#allocation7 + $0x1], 0 }
   0x8   :  { %14 = vsyncpa [#allocation5], 0 }
   0x9   :  { %16 = vsyncpa [#allocation5 + $0x1], 0  ;;  %s1133_s12 = smov 0   ;;  %s1135_s13 = smov 0  }
   0xa   :  { %s1137_s14 = smov 0   ;;  %s1139_s15 = smov 0  }
   0xb   :  { %s1141_s16 = smov 0   ;;  %s1143_s17 = smov 0  }
   0xc   :  { %s1145_s18 = smov 0   ;;  %s1147_s19 = smov 0  }
   0xd   :  { %s1149_s20 = smov 0   ;;  %s1151_s21 = smov 0  }
   0xe   :  { %s1153_s22 = smov 0   ;;  %s1155_s23 = smov 0  }
   0xf   :  { %s1157_s24 = smov 0   ;;  %s1159_s25 = smov 0  }
  0x10 LB: > { %1506 = sst [smem:[#allocation14_spill]] %s1083_s20  ;;  %s34_s26 = sadd.s32 1, %s1095_s23  ;;  %s1103_s25 = sphi %s1159_s25, %s22_s25   ;;  %s1099_s24 = sphi %s1157_s24, %s1544_s24   ;;  %s1095_s23 = sphi %s1155_s23, %s1532_s23   ;;  %s1091_s22 = sphi %s1153_s22, %s1543_s22   ;;  %s1087_s21 = sphi %s1151_s21, %s1542_s21   ;;  %s1083_s20 = sphi %s1149_s20, %s1530_s20   ;;  %s1079_s19 = sphi %s1147_s19, %s1541_s19   ;;  %s1075_s18 = sphi %s1145_s18, %s1540_s18   ;;  %s1071_s17 = sphi %s1143_s17, %s1539_s17   ;;  %s1067_s16 = sphi %s1141_s16, %s1538_s16   ;;  %s1063_s15 = sphi %s1139_s15, %s1537_s15   ;;  %s1059_s14 = sphi %s1137_s14, %s1536_s14   ;;  %s1055_s13 = sphi %s1135_s13, %s1535_s13   ;;  %s1051_s12 = sphi %s1133_s12, %s1534_s12  }
  0x11   : > { %1507 = sst [smem:[#allocation15_spill]] %s1095_s23  ;;  %p1205_p0 = scmp.ge.s32.totalorder %s34_s26, 2 }
  0x12   : > { %p58_p1 = scmp.eq.s32.totalorder %s1103_s25, 0  ;;  %p85_p2 = scmp.ne.s32.totalorder %s1071_s17, %s1067_s16 }
  0x13   : > { %s1546_s26 = smov (%p1205_p0, %s34_s26), 0  ;;  %p91_p4 = scmp.ne.s32.totalorder %s1067_s16, %s1063_s15 }
  0x14   : > { %1509 = sst [smem:[#allocation16_spill]] %s1546_s26  ;;  %p1219_p3 = por %p85_p2, %p58_p1 }
  0x15   : > { %s1227_s4 = ssub.s32 %s1095_s23, %s1546_s26  ;;  %p736_p6 = scmp.lt.s32.totalorder %s1103_s25, 4 }
  0x16   : > { %p48_p5 = scmp.eq.s32.totalorder %s1227_s4, 0  ;;  %s193_s5 = sand.u32 1, %s1103_s25  }
  0x17   : > { %s195_s6 = sand.u32 1, %s1071_s17   ;;  %s678_s8 = sshll.u32 %s1095_s23, 5 }
  0x18   : > { %s634_s7 = sshll.u32 %s195_s6, 6  ;;  %s202_s9 = sadd.s32 %s1099_s24, %s678_s8 }
  0x19   : > { %s637_s10 = sshll.u32 %s202_s9, 2  ;;  %s197_s11 = scalar_lea.vmem [#allocation6], %s634_s7 }
  0x1a   : > { %s207_s29 = sshll.u32 %s197_s11, 4  ;;  %s1511_s1 = sld [smem:[#allocation21_spill]]  ;;  %s208_s29 = int_to_ptr.vmem [resolvable:$true] %s207_s29 }
  0x1b   : > { %p726_p7 = pnand %p736_p6, %p1219_p3  ;;  %s1242_s7 = scalar_lea.sflag [#allocation7], %s193_s5 }
  0x1c   : > { %s1497_s8 = smov 128   ;;  %s1106_s9 = smov 64  }
  0x1d   : > { %s1107_s3 = smov 4   ;;  %p638_p8 = scmp.ge.s32.totalorder %s1103_s25, 1 }
  0x1e   : > { %p232_p9 = scmp.lt.s32.totalorder %s1103_s25, 5  ;;  %p57_p11 = scmp.ne.s32.totalorder %s1083_s20, %s1079_s19 }
  0x1f   : > { %p63_p12 = scmp.ne.s32.totalorder %s1079_s19, %s1075_s18  ;;  %s169_s5 = sand.u32 1, %s1083_s20  }
  0x20   : > { %s204_s26 = scalar_lea.hbm %s1511_s1, %s637_s10  ;;  %p1248_p10 = pnand %p638_p8, %p232_p9 }
  0x21   : > { %s205_s6 = sshll.u32 %s204_s26, 4  ;;  %s50_s26 = sadd.s32 1, %s1083_s20  ;;  %s206_s6 = int_to_ptr.hbm [resolvable:$true] %s205_s6 }
  0x22   : > { %728 = dma.hbm_to_vmem [thread:$0]  (!%p726_p7), %s206_s6, 1024, %s208_s29, %s1242_s7, %s1497_s8, %s1106_s9, %s1107_s3  }
  0x23   : > { %s1256_s30 = scalar_select %p48_p5, %s1083_s20, %s50_s26  }
  0x24   : > { %s633_s10 = sshll.u32 %s1095_s23, 3  ;;  %p59_p13 = por %p58_p1, %p57_p11 }
  0x25   : > { %1513 = sst [smem:[#allocation17_spill]] %s1256_s30  ;;  %s711_s29 = smul.u32 56, %s169_s5 }
  0x26   : > { %s1514_s0 = sld [smem:[#allocation20_spill]]  ;;  %p723_p2 = pnand %p736_p6, %p59_p13 }
  0x27   : > { %s173_s26 = scalar_lea.vmem [#allocation3], %s711_s29  ;;  %s170_s1 = scalar_lea.sflag [#allocation4], %s169_s5 }
  0x28   : > { %s183_s8 = sshll.u32 %s173_s26, 4  ;;  %s1108_s11 = smov 256   ;;  %s184_s8 = int_to_ptr.vmem [resolvable:$true] %s183_s8 }
  0x29   : > { %s1515_s6 = smov 128   ;;  %s1516_s29 = sadd.s32 1, %s1099_s24 }
  0x2a   : > { %s1548_s29 = smov (!%p1205_p0, %s1516_s29), %s1099_s24  ;;  %p111_p9 = scmp.ne.s32.totalorder %s1059_s14, %s1055_s13 }
  0x2b   : > { %p39_p8 = scmp.ge.s32.totalorder %s1548_s29, 2  ;;  %p117_p0 = scmp.ne.s32.totalorder %s1055_s13, %s1051_s12 }
  0x2c   : > { %s180_s9 = scalar_lea.hbm %s1514_s0, %s633_s10  ;;  %s1109_s10 = smov 8  }
  0x2d   : > { %s181_s3 = sshll.u32 %s180_s9, 4  ;;  %s1273_s9 = sadd.s32 4294967295, %s1103_s25   ;;  %s182_s3 = int_to_ptr.hbm [resolvable:$true] %s181_s3 }
  0x2e   : > { %725 = dma.hbm_to_vmem [thread:$0]  (!%p723_p2), %s182_s3, 896, %s184_s8, %s170_s1, %s1108_s11, %s1515_s6, %s1109_s10  }
  0x2f   : > { %s630_s0 = sadd.s32 4294967294, %s1103_s25   ;;  %p64_p3 = scmp.eq.s32.totalorder %s1273_s9, 0 }
  0x30   : > { %s104_s8 = sadd.s32 1, %s1059_s14  ;;  %s1550_s29 = smov (%p39_p8, %s1548_s29), 0 }
  0x31   : > { %p1285_p5 = por %p64_p3, %p63_p12  ;;  %p1292_p7 = por %p91_p4, %p64_p3 }
  0x32   : > { %1519 = sst [smem:[#allocation18_spill]] %s1550_s29  ;;  %p1305_p11 = por %p111_p9, %p58_p1 }
  0x33   : > { %p1312_p4 = por %p117_p0, %p64_p3  ;;  %s74_s28 = ssub.s32 %s1099_s24, %s1550_s29 }
  0x34   : > { %p143_p12 = scmp.eq.s32.totalorder %s1273_s9, 3  ;;  %s75_s3 = sor.u32 %s74_s28, %s1227_s4 }
  0x35   : > { %p102_p13 = scmp.eq.s32.totalorder %s74_s28, 0  ;;  %p76_p2 = scmp.eq.s32.totalorder %s75_s3, 0 }
  0x36   : > { %p1320_p8 = por %p143_p12, %p111_p9  ;;  %s1524_s10 = sadd.s32 1, %s1071_s17 }
  0x37   : > { %s1325_s11 = scalar_select %p102_p13, %s1059_s14, %s104_s8  }
  0x38   : > { %s1522_s26 = scalar_select %p1320_p8, 1, 0 }
  0x39   : > { %s1330_s6 = scalar_select %p76_p2, %s1071_s17, %s1524_s10  }
  0x3a   : > { %1523 = sst [smem:[#allocation19_spill]] %s1522_s26  ;;  %p149_p1 = scmp.eq.s32.totalorder %s630_s0, 3 }
  0x3b   : > { %s219_s23 = sand.u32 1, %s1059_s14   ;;  %s223_s20 = scalar_lea.hbm %s1493_s2, %s1099_s24 }
  0x3c   : > { %p1340_p3 = por %p149_p1, %p117_p0  ;;  %s225_s28 = sshll.u32 %s223_s20, 4  ;;  %s226_s28 = int_to_ptr.hbm [resolvable:$true] %s225_s28 }
  0x3d   : > { %s220_s3 = scalar_lea.vmem [#allocation8], %s219_s23  ;;  %p729_p9 = pnand %p736_p6, %p1305_p11 }
  0x3e   : > { %s227_s26 = sshll.u32 %s220_s3, 4  ;;  %236 = sbr.rel (%p1248_p10) target bundleno = 314 (0x13a), region = 32  ;;  %s228_s26 = int_to_ptr.vmem [resolvable:$true] %s227_s26 }
  0x3f   : > { %731 = dma.hbm_to_vmem [thread:$0]  (!%p729_p9), %s226_s28, 16, %s228_s26, %s1242_s7  }
  0x40   : > { %s238_s0 = sand.u32 (!%p1248_p10), 1, %s1079_s19  }
  0x41   : > { %s712_s30 = smul.u32 (!%p1248_p10), 56, %s238_s0  ;;  %s239_s29 = scalar_lea.sflag (!%p1248_p10), [#allocation4], %s238_s0 }
  0x43   : > { %s242_s8 = scalar_lea.vmem [#allocation3], %s712_s30 }
  0x44   : > { %1034 = dma.done.wait (%p1285_p5), %s239_s29, 896  }
  0x45   : > { %1036 = vsyncadd (%p1285_p5), %s239_s29, 4294966400  ;;  %s248_s20 = sand.u32 1, %s1273_s9   ;;  %s250_s23 = sand.u32 1, %s1067_s16  }
  0x46   : > { %s639_s7 = sshll.u32 %s250_s23, 6  ;;  %s249_s15 = scalar_lea.sflag [#allocation7], %s248_s20 }
  0x47   : > { %s1358_s27 = scalar_lea.vmem [#allocation6], %s639_s7 }
  0x48   : > { %1038 = dma.done.wait (%p1292_p7), %s249_s15, 1024  }
  0x49   : > { %1040 = vsyncadd (%p1292_p7), %s249_s15, 4294966272  ;;  %s1365_s26 = sand.u32 1, %s1055_s13  }
  0x4a   : > { %s261_s5 = scalar_lea.vmem [#allocation8], %s1365_s26 }
  0x4b   : > { %1042 = dma.done.wait (%p1312_p4), %s249_s15, 16  }
  0x4c   : > { %1044 = vsyncadd (%p1312_p4), %s249_s15, 4294967280  ;;  %s713_s9 = smul.u32 56, %s1365_s26  ;;  %v1373_v0 = vld [vmem:[%s242_s8] sm:$0xff]  ;;  %v1375_v1 = vld [vmem:[%s242_s8 + $0x8] sm:$0xff]  ;;  %p640_p6 = scmp.ne.s32.totalorder %s1087_s21, 0 }
  0x4d   : > { %v1377_v2 = vld [vmem:[%s242_s8 + $0x10] sm:$0xff]  ;;  %v1379_v3 = vld [vmem:[%s242_s8 + $0x18] sm:$0xff]  ;;  %v1381_v4 = vld [vmem:[%s242_s8 + $0x20] sm:$0xff] }
  0x4e   : > { %v1383_v5 = vld [vmem:[%s242_s8 + $0x28] sm:$0xff]  ;;  %v1385_v6 = vld [vmem:[%s242_s8 + $0x30] sm:$0x3]  ;;  %s1387_s1 = scalar_lea.vmem [#allocation9], %s713_s9  ;;  %307 = sbr.rel (%p640_p6) target bundleno = 91 (0x5b), region = 48 }
  0x53   : > { %v858_v7 = vld [vmem:[%s261_s5] ss:$0 sm:$0xff] }
  0x54   : > { %312 = vst [vmem:[#allocation2 + $0x30] sm:$0xff] %v858_v7 }
  0x55   : > { %313 = vst [vmem:[#allocation2] sm:$0xff] %v858_v7 }
  0x56   : > { %314 = vst [vmem:[#allocation2 + $0x18] sm:$0xff] %v858_v7 }
  0x57   : > { %315 = vst [vmem:[#allocation2 + $0x10] sm:$0xff] %v858_v7 }
  0x58   : > { %316 = vst [vmem:[#allocation2 + $0x8] sm:$0xff] %v858_v7 }
  0x59   : > { %317 = vst [vmem:[#allocation2 + $0x20] sm:$0xff] %v858_v7 }
  0x5a   : > { %318 = vst [vmem:[#allocation2 + $0x28] sm:$0x3] %v858_v7 }
  0x5b PF: > { %p641_p10 = scmp.ne.s32.totalorder %s1087_s21, %s1091_s22 }
  0x5d   : > { %322 = sbr.rel (%p641_p10) target bundleno = 108 (0x6c), region = 52 }
  0x62   : > { %v323_v8 = vld [vmem:[#allocation2 + $0x30] sm:$0xff]  ;;  %v324_v9 = vld [vmem:[#allocation2] sm:$0xff]  ;;  %v325_v10 = vld [vmem:[#allocation2 + $0x18] sm:$0xff] }
  0x63   : > { %v330_v11 = vadd.f32 %v323_v8, %v1373_v0  ;;  %v331_v12 = vadd.f32 %v324_v9, %v1375_v1  ;;  %v332_v13 = vadd.f32 %v325_v10, %v1377_v2  ;;  %v326_v14 = vld [vmem:[#allocation2 + $0x10] sm:$0xff]  ;;  %v327_v15 = vld [vmem:[#allocation2 + $0x8] sm:$0xff]  ;;  %v328_v16 = vld [vmem:[#allocation2 + $0x20] sm:$0xff] }
  0x64   : > { %v333_v17 = vadd.f32 %v326_v14, %v1379_v3  ;;  %v329_v18 = vld [vmem:[#allocation2 + $0x28] sm:$0x3]  ;;  %v334_v19 = vadd.f32 %v327_v15, %v1381_v4  ;;  %v335_v20 = vadd.f32 %v328_v16, %v1383_v5 }
  0x65   : > { %337 = vst [vmem:[#allocation2 + $0x30] sm:$0xff] %v330_v11  ;;  %v336_v21 = vadd.f32 %v329_v18, %v1385_v6 }
  0x66   : > { %338 = vst [vmem:[#allocation2] sm:$0xff] %v331_v12 }
  0x67   : > { %339 = vst [vmem:[#allocation2 + $0x18] sm:$0xff] %v332_v13 }
  0x68   : > { %340 = vst [vmem:[#allocation2 + $0x10] sm:$0xff] %v333_v17 }
  0x69   : > { %341 = vst [vmem:[#allocation2 + $0x8] sm:$0xff] %v334_v19 }
  0x6a   : > { %342 = vst [vmem:[#allocation2 + $0x20] sm:$0xff] %v335_v20 }
  0x6b   : > { %343 = vst [vmem:[#allocation2 + $0x28] sm:$0x3] %v336_v21 }
  0x6c PF: > { %v686_v22 = vld [vmem:[%s1358_s27 + $0x38] sm:$0xff]  ;;  %v685_v23 = vld [vmem:[%s1358_s27 + $0x30] sm:$0xff]  ;;  %v684_v24 = vld [vmem:[%s1358_s27 + $0x28] sm:$0xff]  ;;  %v351_v30 = vpack.c.bf16 %v1375_v1, %v1373_v0  ;;  %v352_v31 = vpack.c.bf16 %v1379_v3, %v1377_v2  ;;  %v353_v32 = vpack.c.bf16 %v1383_v5, %v1381_v4  ;;  %v354_v33 = vpack.c.bf16 %v1385_v6, %v1385_v6  ;;  %p674_p5 = scmp.ne.s32.totalorder %s1087_s21, 1 }
  0x6d   : > { %419 = vmatpush.bf16.msra.mxu0 %v686_v22  ;;  %687 = vmatpush.bf16.msra.mxu1 %v686_v22  ;;  %v683_v25 = vld [vmem:[%s1358_s27 + $0x20] sm:$0xff]  ;;  %v682_v26 = vld [vmem:[%s1358_s27 + $0x18] sm:$0xff]  ;;  %v681_v27 = vld [vmem:[%s1358_s27 + $0x10] sm:$0xff] }
  0x6e   : > { %688 = vmatpush.bf16.msra.mxu2 %v686_v22  ;;  %689 = vmatpush.bf16.msra.mxu3 %v686_v22  ;;  %v680_v28 = vld [vmem:[%s1358_s27 + $0x8] sm:$0xff]  ;;  %v679_v29 = vld [vmem:[%s1358_s27] sm:$0xff]  ;;  %v346_v35 = vld [vmem:[#allocation2 + $0x18] sm:$0xff] }
  0x6f   : > { %v344_v34 = vld [vmem:[#allocation2 + $0x30] sm:$0xff]  ;;  %v345_v42 = vld [vmem:[#allocation2] sm:$0xff] }
  0x70   : > { %v348_v40 = vld [vmem:[#allocation2 + $0x8] sm:$0xff]  ;;  %v347_v43 = vld [vmem:[#allocation2 + $0x10] sm:$0xff] }
  0x71   : > { %420 = vmatpush.bf16.msra.mxu0 %v685_v23  ;;  %690 = vmatpush.bf16.msra.mxu1 %v685_v23  ;;  %v349_v52 = vld [vmem:[#allocation2 + $0x20] sm:$0xff] }
  0x72   : > { %691 = vmatpush.bf16.msra.mxu2 %v685_v23  ;;  %692 = vmatpush.bf16.msra.mxu3 %v685_v23  ;;  %v350_v41 = vld [vmem:[#allocation2 + $0x28] sm:$0x3] }
  0x75   : > { %421 = vmatpush.bf16.msra.mxu0 %v684_v24  ;;  %693 = vmatpush.bf16.msra.mxu1 %v684_v24 }
  0x76   : > { %694 = vmatpush.bf16.msra.mxu2 %v684_v24  ;;  %695 = vmatpush.bf16.msra.mxu3 %v684_v24 }
  0x79   : > { %422 = vmatpush.bf16.msra.mxu0 %v683_v25  ;;  %696 = vmatpush.bf16.msra.mxu1 %v683_v25 }
  0x7a   : > { %697 = vmatpush.bf16.msra.mxu2 %v683_v25  ;;  %698 = vmatpush.bf16.msra.mxu3 %v683_v25 }
  0x7d   : > { %423 = vmatpush.bf16.msra.mxu0 %v682_v26  ;;  %699 = vmatpush.bf16.msra.mxu1 %v682_v26 }
  0x7e   : > { %700 = vmatpush.bf16.msra.mxu2 %v682_v26  ;;  %701 = vmatpush.bf16.msra.mxu3 %v682_v26 }
  0x81   : > { %424 = vmatpush.bf16.msra.mxu0 %v681_v27  ;;  %702 = vmatpush.bf16.msra.mxu1 %v681_v27 }
  0x82   : > { %703 = vmatpush.bf16.msra.mxu2 %v681_v27  ;;  %704 = vmatpush.bf16.msra.mxu3 %v681_v27 }
  0x85   : > { %425 = vmatpush.bf16.msra.mxu0 %v680_v28  ;;  %705 = vmatpush.bf16.msra.mxu1 %v680_v28 }
  0x86   : > { %706 = vmatpush.bf16.msra.mxu2 %v680_v28  ;;  %707 = vmatpush.bf16.msra.mxu3 %v680_v28 }
  0x89   : > { %426 = vmatpush.bf16.msra.mxu0 %v679_v29  ;;  %708 = vmatpush.bf16.msra.mxu1 %v679_v29 }
  0x8a   : > { %709 = vmatpush.bf16.msra.mxu2 %v679_v29  ;;  %710 = vmatpush.bf16.msra.mxu3 %v679_v29 }
  0x8c   : > { %427 = vmatmul.bf16.vlgmr.msra.gmra.mxu0 %v351_v30  ;;  %432 = vmatmul.bf16.vlgmr.msra.gmra.mxu1 %v352_v31 }
  0x8d   : > { %437 = vmatmul.bf16.vlgmr.msra.gmra.mxu2 %v353_v32  ;;  %442 = vmatmul.bf16.vlgmr.msra.gmra.mxu3 %v354_v33 }
 0x109   : > { %v428_v36 = vpop.f32.mrf.mxu0  ;;  %v433_v37 = vpop.f32.mrf.mxu1 }
 0x10a   : > { %v447_v38 = vadd.f32 %v428_v36, %v344_v34  ;;  %v449_v39 = vadd.f32 %v433_v37, %v346_v35 }
 0x10c   : > { %454 = vst [vmem:[#allocation2 + $0x30] sm:$0xff] %v447_v38 }
 0x10d   : > { %456 = vst [vmem:[#allocation2 + $0x18] sm:$0xff] %v449_v39 }
 0x110   : > { %v438_v44 = vpop.f32.mrf.mxu2  ;;  %v443_v45 = vpop.f32.mrf.mxu3 }
 0x111   : > { %v451_v46 = vadd.f32 %v438_v44, %v348_v40  ;;  %v453_v47 = vadd.f32 %v443_v45, %v350_v41  ;;  %v430_v48 = vpop.f32.mrf.mxu0  ;;  %v435_v49 = vpop.f32.mrf.mxu1 }
 0x112   : > { %v448_v50 = vadd.f32 %v430_v48, %v345_v42  ;;  %v450_v51 = vadd.f32 %v435_v49, %v347_v43 }
 0x113   : > { %458 = vst [vmem:[#allocation2 + $0x8] sm:$0xff] %v451_v46 }
 0x114   : > { %460 = vst [vmem:[#allocation2 + $0x28] sm:$0x3] %v453_v47 }
 0x115   : > { %455 = vst [vmem:[#allocation2] sm:$0xff] %v448_v50 }
 0x116   : > { %457 = vst [vmem:[#allocation2 + $0x10] sm:$0xff] %v450_v51 }
 0x117   : > { %464 = sbr.rel (%p674_p5) target bundleno = 292 (0x124), region = 56 }
 0x118   : > { %v440_v53 = vpop.f32.mrf.mxu2  ;;  %v445_v54 = vpop.f32.mrf.mxu3 }
 0x119   : > { %v452_v55 = vadd.f32 %v440_v53, %v349_v52 }
 0x11b   : > { %459 = vst [vmem:[#allocation2 + $0x20] sm:$0xff] %v452_v55 }
 0x11c   : > { %v465_v56 = vld [vmem:[#allocation2 + $0x30] sm:$0xff]  ;;  %v466_v57 = vld [vmem:[#allocation2] sm:$0xff]  ;;  %v467_v58 = vld [vmem:[#allocation2 + $0x18] sm:$0xff] }
 0x11d   : > { %472 = vst [vmem:[%s1387_s1] sm:$0xff] %v465_v56  ;;  %v468_v59 = vld [vmem:[#allocation2 + $0x10] sm:$0xff]  ;;  %v469_v60 = vld [vmem:[#allocation2 + $0x8] sm:$0xff] }
 0x11e   : > { %473 = vst [vmem:[%s1387_s1 + $0x8] sm:$0xff] %v466_v57  ;;  %v471_v62 = vld [vmem:[#allocation2 + $0x28] sm:$0x3] }
 0x11f   : > { %474 = vst [vmem:[%s1387_s1 + $0x10] sm:$0xff] %v467_v58 }
 0x120   : > { %475 = vst [vmem:[%s1387_s1 + $0x18] sm:$0xff] %v468_v59 }
 0x121   : > { %476 = vst [vmem:[%s1387_s1 + $0x20] sm:$0xff] %v469_v60 }
 0x122   : > { %v470_v61 = vld [vmem:[#allocation2 + $0x20] sm:$0xff]  ;;  %478 = vst [vmem:[%s1387_s1 + $0x30] sm:$0x3] %v471_v62 }
 0x123   : > { %477 = vst [vmem:[%s1387_s1 + $0x28] sm:$0xff] %v470_v61 }
 0x124 PF: > { %s675_s18 = sshll.u32 %s1091_s22, 3  ;;  %s1527_s3 = sld [smem:[#allocation22_spill]] }
 0x125   : > { %s494_s30 = sshll.u32 %s1387_s1, 4  ;;  %s480_s8 = scalar_lea.sflag [#allocation5], %s1365_s26  ;;  %s495_s30 = int_to_ptr.vmem [resolvable:$true] %s494_s30 }
 0x12a   : > { %s493_s0 = scalar_lea.hbm %s1527_s3, %s675_s18  ;;  %s969_s22 = scalar_lea.hbm %s1527_s3, 112 }
 0x12b   : > { %s496_s29 = sshll.u32 %s493_s0, 4  ;;  %s497_s29 = int_to_ptr.hbm [resolvable:$true] %s496_s29 }
 0x12c   : > { %s963_s20 = sshra.s32 %s497_s29, 4  ;;  %s964_s20 = int_to_ptr.hbm [resolvable:$true] %s963_s20 }
 0x12d   : > { %s965_s23 = scalar_lea.hbm %s964_s20, 56  ;;  %p970_p4 = scmp.lt.s32.totalorder %s964_s20, %s1527_s3 }
 0x12e   : > { %p966_p7 = scmp.ne.s32.totalorder %s964_s20, %s965_s23  ;;  %p971_p12 = scmp.lt.s32.totalorder %s969_s22, %s965_s23 }
 0x130   : > { %p967_p0 = pnand %p966_p7, %p1320_p8  ;;  %p972_p13 = por %p971_p12, %p970_p4 }
 0x132   : > { %p968_p11 = pneg %p967_p0 }
 0x134   : > { %p973_p2 = pnand %p972_p13, %p968_p11 }
 0x136   : > { %976 = shalt.err (!%p973_p2)
}
 0x137   : > { %s1110_s26 = smov 128   ;;  %s1111_s9 = smov 256  }
 0x138   : > { %s1112_s1 = smov 8  }
 0x139   : > { %720 = dma.vmem_to_hbm [thread:$0]  (%p1320_p8), %s495_s30, 896, %s497_s29, %s480_s8, %s1110_s26, %s1111_s9, %s1112_s1  }
 0x13a PF: > { %p737_p1 = scmp.ge.s32.totalorder %s1103_s25, 2  ;;  %s511_s18 = sand.u32 1, %s1051_s12  }
 0x13b   : > { %s512_s10 = scalar_lea.sflag [#allocation5], %s511_s18 }
 0x13c   : > { %p733_p9 = pnand %p737_p1, %p1340_p3 }
 0x13e   : > { %p734_p6 = pneg %p733_p9 }
 0x140   : > { %1046 = dma.done.wait (%p734_p6), %s512_s10, 896  }
 0x141   : > { %1048 = vsyncadd (%p734_p6), %s512_s10, 4294966400  ;;  %s22_s25 = sadd.s32 1, %s1103_s25   ;;  %s1529_s21 = sld [smem:[#allocation14_spill]] }
 0x142   : > { %p1444_p10 = scmp.ge.s32.totalorder %s22_s25, 6   ;;  %s1530_s20 = sld [smem:[#allocation17_spill]] }
 0x143   : > { %s1531_s4 = sld [smem:[#allocation15_spill]]  ;;  %s1534_s12 = smov %s1055_s13 }
 0x144   : > { %s1532_s23 = sld [smem:[#allocation16_spill]]  ;;  %s1535_s13 = smov %s1059_s14 }
 0x145   : > { %s1533_s0 = sld [smem:[#allocation18_spill]]  ;;  %s1536_s14 = smov %s1325_s11 }
 0x146   : > { %s1537_s15 = smov %s1067_s16  ;;  %s1538_s16 = smov %s1071_s17 }
 0x147   : > { %s1539_s17 = smov %s1330_s6  ;;  %s1540_s18 = smov %s1079_s19 }
 0x148   : > { %s1541_s19 = smov %s1529_s21  ;;  %s1543_s22 = smov %s1099_s24 }
 0x149   : > { %s1542_s21 = smov %s1531_s4  ;;  %21 = sbr.rel (!%p1444_p10) target bundleno = 16 (0x10), region = 113 }
 0x14b   : > { %s1544_s24 = smov %s1533_s0 }
 0x14e   :  { %518 = vsyncpa [#allocation4], 1 }
 0x14f   :  { %520 = vsyncpa [#allocation4 + $0x1], 1 }
 0x150   :  { %521 = vsyncpa [#allocation7], 1 }
 0x151   :  { %523 = vsyncpa [#allocation7 + $0x1], 1 }
 0x152   :  { %524 = vsyncpa [#allocation5], 1 }
 0x153   :  { %526 = vsyncpa [#allocation5 + $0x1], 1 }

</bundles_post_ra>
